<compile_context>
chip_gen: v6e
topology: v6e:2x2x1
jax: 0.10.0
libtpu: 0.0.40
codegen_flags: <defaults>
</compile_context>

<pallas_src>
import jax
import jax.numpy as jnp
from jax.experimental import pallas as pl
from jax.experimental.pallas import tpu as pltpu

HIDDEN = 128


def _ceil_to(v, m):
    return ((v + m - 1) // m) * m


def autoencoder_kernel(x_ref, w1_ref, b1_ref, w23_ref, b23_ref,
                       w4_ref, b4_ref, out_ref):
    """Fused forward for one batch tile: 3 MXU matmuls, f32 epilogue."""
    # (tile, D) @ (D, 128) -> f32 accumulate
    h = jnp.dot(x_ref[...], w1_ref[...], preferred_element_type=jnp.float32)
    h = jnp.maximum(h + b1_ref[...], 0.0)

    # Collapsed encoder-L2 + decoder-L1: (tile, 128) @ (128, 128)
    g = jnp.dot(h.astype(w23_ref.dtype), w23_ref[...],
                preferred_element_type=jnp.float32)
    g = jnp.maximum(g + b23_ref[...], 0.0)

    # Decoder-L2: (tile, 128) @ (128, D)
    y = jnp.dot(g.astype(w4_ref.dtype), w4_ref[...],
                preferred_element_type=jnp.float32)
    out_ref[...] = (y + b4_ref[...]).astype(out_ref.dtype)


def autoencoder_forward(x, params, *, batch_tile=None, compute_dtype=None):
    (w1, b1, w2, b2, w3, b3, w4, b4) = params
    B, D = x.shape
    H = w1.shape[1]
    assert H == HIDDEN

    if compute_dtype is None:
        compute_dtype = x.dtype
    f32 = jnp.float32

    # Exact algebraic collapse of the two latent-dim linears (done in f32).
    w23 = jnp.dot(w2.astype(f32), w3.astype(f32))
    b23 = jnp.dot(b2.astype(f32), w3.astype(f32)) + b3.astype(f32)

    # MXU inputs in compute_dtype; biases stay f32 (epilogue is f32).
    xc = x.astype(compute_dtype)
    w1c, w23c, w4c = (w1.astype(compute_dtype), w23.astype(compute_dtype),
                      w4.astype(compute_dtype))
    b1c, b23c, b4c = b1.astype(f32), b23, b4.astype(f32)

    # ---- batch tiling -----------------------------------------------------
    if batch_tile is None:
        if B <= 16:
            batch_tile = _ceil_to(max(B, 1), 8)
        else:
            # Big tiles amortize per-step overhead; keep >=2 steps for the
            # v7x megacore; cap at 1024 rows (tiny VMEM footprint anyway).
            batch_tile = min(1024, _ceil_to(max(8, B // 2), 8))
    batch_tile = max(8, _ceil_to(batch_tile, 8))

    B_pad = _ceil_to(B, batch_tile)
    if B_pad != B:
        xc = jnp.pad(xc, ((0, B_pad - B), (0, 0)))
    grid = (B_pad // batch_tile,)

    # ---- VMEM budget (lane-padded) + cost estimate ------------------------
    lane = 128
    d_pad = _ceil_to(D, lane)
    in_b = jnp.dtype(compute_dtype).itemsize
    out_b = jnp.dtype(x.dtype).itemsize
    vmem_est = (2 * batch_tile * d_pad * in_b          # double-buffered x tiles
                + 2 * batch_tile * d_pad * out_b       # double-buffered out tiles
                + 2 * batch_tile * H * 4               # h, g f32 activations
                + 4 * (D * H + H * H + H * d_pad) * in_b   # weights (x2 buffers)
                + 4 * 3 * max(H, d_pad) * 4)           # biases
    vmem_limit = int(min(48 << 20, max(2 * vmem_est, 16 << 20)))

    flops = 2 * B_pad * (D * H + H * H + H * D)
    bytes_accessed = int(B_pad * D * (in_b + out_b)
                         + (D * H + H * H + H * D) * in_b
                         + 3 * H * 4)
    cost = pl.CostEstimate(flops=flops, transcendentals=0,
                           bytes_accessed=bytes_accessed)

    def whole(shape):
        # Small weights/biases: every grid step sees the full array (VMEM-resident).
        return pl.BlockSpec(shape, lambda i, _n=len(shape): (0,) * _n)

    out = pl.pallas_call(
        autoencoder_kernel,
        out_shape=jax.ShapeDtypeStruct((B_pad, D), x.dtype),
        grid_spec=pltpu.PrefetchScalarGridSpec(
            num_scalar_prefetch=0,
            grid=grid,
            in_specs=[
                pl.BlockSpec((batch_tile, D), lambda i: (i, 0)),   # x
                whole((D, H)), whole((1, H)),                      # enc layer 1
                whole((H, H)), whole((1, H)),                      # collapsed mid
                whole((H, D)), whole((1, D)),                      # dec layer 2
            ],
            out_specs=pl.BlockSpec((batch_tile, D), lambda i: (i, 0)),
        ),
        compiler_params=pltpu.CompilerParams(
            dimension_semantics=("parallel",),
            vmem_limit_bytes=vmem_limit),
        cost_estimate=cost,
    )(xc, w1c, b1c, w23c, b23c, w4c, b4c)

    return out[:B] if B_pad != B else out


def init_params(key, input_dim, latent_dim, hidden=HIDDEN, dtype=jnp.float32):
    """Deterministic init mimicking nn.Linear's U(-1/sqrt(fan_in), 1/sqrt(fan_in))."""
    def linear(k, fan_in, fan_out):
        kw, kb = jax.random.split(k)
        bound = 1.0 / jnp.sqrt(fan_in)
        w = jax.random.uniform(kw, (fan_in, fan_out), dtype, -bound, bound)
        b = jax.random.uniform(kb, (1, fan_out), dtype, -bound, bound)
        return w, b

    k1, k2, k3, k4 = jax.random.split(key, 4)
    w1, b1 = linear(k1, input_dim, hidden)    # encoder[0]
    w2, b2 = linear(k2, hidden, latent_dim)   # encoder[2]
    w3, b3 = linear(k3, latent_dim, hidden)   # decoder[0]
    w4, b4 = linear(k4, hidden, input_dim)    # decoder[2]
    return (w1, b1, w2, b2, w3, b3, w4, b4)


def reference_forward(x, params):
    (w1, b1, w2, b2, w3, b3, w4, b4) = params
    h = jnp.maximum(x @ w1 + b1, 0.0)
    z = h @ w2 + b2
    g = jnp.maximum(z @ w3 + b3, 0.0)
    return g @ w4 + b4


if __name__ == "__main__":
    input_dim = 16    # train_X.shape[1]
    latent_dim = 2

    key = jax.random.PRNGKey(0)
    kx, kp, kx2 = jax.random.split(key, 3)
    params = init_params(kp, input_dim, latent_dim)

    # --- small toy case (matches the original example's scale), f32 path ---
    x_small = jax.random.normal(kx, (8, input_dim), jnp.float32)
    out_small = jax.block_until_ready(autoencoder_forward(x_small, params))
    ref_small = reference_forward(x_small, params)
    assert out_small.shape == x_small.shape
    assert jnp.allclose(out_small, ref_small, atol=1e-4, rtol=1e-4)

    # --- multi-tile grid (2 steps) with bf16 MXU inputs / f32 accumulation ---
    x_big = jax.random.normal(kx2, (256, input_dim), jnp.float32)
    out_big = jax.block_until_ready(
        autoencoder_forward(x_big, params, compute_dtype=jnp.bfloat16))
    ref_big = reference_forward(x_big, params)
    assert out_big.shape == x_big.shape
    assert jnp.allclose(out_big, ref_big, atol=5e-2, rtol=5e-2)

    print("KERNEL_OK")
</pallas_src>

<mosaic_0001>
module attributes {stable_mosaic.version = 11 : i64} {
  func.func @autoencoder_kernel(%arg0: i32, %arg1: memref<8x16xf32, #tpu.memory_space<vmem>>, %arg2: memref<16x128xf32, #tpu.memory_space<vmem>>, %arg3: memref<1x128xf32, #tpu.memory_space<vmem>>, %arg4: memref<128x128xf32, #tpu.memory_space<vmem>>, %arg5: memref<1x128xf32, #tpu.memory_space<vmem>>, %arg6: memref<128x16xf32, #tpu.memory_space<vmem>>, %arg7: memref<1x16xf32, #tpu.memory_space<vmem>>, %arg8: memref<8x16xf32, #tpu.memory_space<vmem>>) attributes {dimension_semantics = [#tpu.dimension_semantics<parallel>], iteration_bounds = array<i64: 1>, scalar_prefetch = 0 : i64, scratch_operands = 0 : i64, tpu.core_type = #tpu.core_type<tc>, window_params = [{transform_indices = @transform_0, window_bounds = array<i64: 8, 16>}, {pipeline_mode = #tpu.pipeline_mode<synchronous>, transform_indices = @transform_1, window_bounds = array<i64: 16, 128>}, {pipeline_mode = #tpu.pipeline_mode<synchronous>, transform_indices = @transform_2, window_bounds = array<i64: 1, 128>}, {pipeline_mode = #tpu.pipeline_mode<synchronous>, transform_indices = @transform_3, window_bounds = array<i64: 128, 128>}, {pipeline_mode = #tpu.pipeline_mode<synchronous>, transform_indices = @transform_4, window_bounds = array<i64: 1, 128>}, {pipeline_mode = #tpu.pipeline_mode<synchronous>, transform_indices = @transform_5, window_bounds = array<i64: 128, 16>}, {pipeline_mode = #tpu.pipeline_mode<synchronous>, transform_indices = @transform_6, window_bounds = array<i64: 1, 16>}, {transform_indices = @transform_7, window_bounds = array<i64: 8, 16>}]} {
    %c0 = arith.constant 0 : index
    %c0_0 = arith.constant 0 : index
    %0 = vector.load %arg1[%c0, %c0_0] : memref<8x16xf32, #tpu.memory_space<vmem>>, vector<8x16xf32>
    %c0_1 = arith.constant 0 : index
    %c0_2 = arith.constant 0 : index
    %1 = vector.load %arg2[%c0_1, %c0_2] : memref<16x128xf32, #tpu.memory_space<vmem>>, vector<16x128xf32>
    %cst = arith.constant dense<0.000000e+00> : vector<8x128xf32>
    %2 = tpu.matmul %0, %1, %cst {dimension_numbers = #tpu.dot_dimension_numbers<[1], [0], [0], [1], [0, 0, 1, 1], [], []>} : vector<8x16xf32>, vector<16x128xf32>, vector<8x128xf32> -> vector<8x128xf32>
    %c0_3 = arith.constant 0 : index
    %c0_4 = arith.constant 0 : index
    %3 = vector.load %arg3[%c0_3, %c0_4] : memref<1x128xf32, #tpu.memory_space<vmem>>, vector<1x128xf32>
    %4 = vector.broadcast %3 : vector<1x128xf32> to vector<8x128xf32>
    %5 = arith.addf %2, %4 : vector<8x128xf32>
    %cst_5 = arith.constant 0.000000e+00 : f32
    %6 = vector.broadcast %cst_5 : f32 to vector<8x128xf32>
    %7 = arith.maximumf %5, %6 : vector<8x128xf32>
    %c0_6 = arith.constant 0 : index
    %c0_7 = arith.constant 0 : index
    %8 = vector.load %arg4[%c0_6, %c0_7] : memref<128x128xf32, #tpu.memory_space<vmem>>, vector<128x128xf32>
    %cst_8 = arith.constant dense<0.000000e+00> : vector<8x128xf32>
    %9 = tpu.matmul %7, %8, %cst_8 {dimension_numbers = #tpu.dot_dimension_numbers<[1], [0], [0], [1], [0, 0, 1, 1], [], []>} : vector<8x128xf32>, vector<128x128xf32>, vector<8x128xf32> -> vector<8x128xf32>
    %c0_9 = arith.constant 0 : index
    %c0_10 = arith.constant 0 : index
    %10 = vector.load %arg5[%c0_9, %c0_10] : memref<1x128xf32, #tpu.memory_space<vmem>>, vector<1x128xf32>
    %11 = vector.broadcast %10 : vector<1x128xf32> to vector<8x128xf32>
    %12 = arith.addf %9, %11 : vector<8x128xf32>
    %cst_11 = arith.constant 0.000000e+00 : f32
    %13 = vector.broadcast %cst_11 : f32 to vector<8x128xf32>
    %14 = arith.maximumf %12, %13 : vector<8x128xf32>
    %c0_12 = arith.constant 0 : index
    %c0_13 = arith.constant 0 : index
    %15 = vector.load %arg6[%c0_12, %c0_13] : memref<128x16xf32, #tpu.memory_space<vmem>>, vector<128x16xf32>
    %cst_14 = arith.constant dense<0.000000e+00> : vector<8x16xf32>
    %16 = tpu.matmul %14, %15, %cst_14 {dimension_numbers = #tpu.dot_dimension_numbers<[1], [0], [0], [1], [0, 0, 1, 1], [], []>} : vector<8x128xf32>, vector<128x16xf32>, vector<8x16xf32> -> vector<8x16xf32>
    %c0_15 = arith.constant 0 : index
    %c0_16 = arith.constant 0 : index
    %17 = vector.load %arg7[%c0_15, %c0_16] : memref<1x16xf32, #tpu.memory_space<vmem>>, vector<1x16xf32>
    %18 = vector.broadcast %17 : vector<1x16xf32> to vector<8x16xf32>
    %19 = arith.addf %16, %18 : vector<8x16xf32>
    %c0_17 = arith.constant 0 : index
    %c0_18 = arith.constant 0 : index
    %20 = vector.load %arg8[%c0_17, %c0_18] : memref<8x16xf32, #tpu.memory_space<vmem>>, vector<8x16xf32>
    tpu.vector_store %arg8[%c0_17, %c0_18], %19 {strides = array<i32>} : memref<8x16xf32, #tpu.memory_space<vmem>>, vector<8x16xf32>,
    return
  }
  func.func @transform_0(%arg0: i32) -> (i32, i32) {
    %c0_i32 = arith.constant 0 : i32
    %c0_i32_0 = arith.constant 0 : i32
    return %arg0, %c0_i32 : i32, i32
  }
  func.func @transform_1(%arg0: i32) -> (i32, i32) {
    %c0_i32 = arith.constant 0 : i32
    %c0_i32_0 = arith.constant 0 : i32
    %c0_i32_1 = arith.constant 0 : i32
    return %c0_i32, %c0_i32_0 : i32, i32
  }
  func.func @transform_2(%arg0: i32) -> (i32, i32) {
    %c0_i32 = arith.constant 0 : i32
    %c0_i32_0 = arith.constant 0 : i32
    %c0_i32_1 = arith.constant 0 : i32
    return %c0_i32, %c0_i32_0 : i32, i32
  }
  func.func @transform_3(%arg0: i32) -> (i32, i32) {
    %c0_i32 = arith.constant 0 : i32
    %c0_i32_0 = arith.constant 0 : i32
    %c0_i32_1 = arith.constant 0 : i32
    return %c0_i32, %c0_i32_0 : i32, i32
  }
  func.func @transform_4(%arg0: i32) -> (i32, i32) {
    %c0_i32 = arith.constant 0 : i32
    %c0_i32_0 = arith.constant 0 : i32
    %c0_i32_1 = arith.constant 0 : i32
    return %c0_i32, %c0_i32_0 : i32, i32
  }
  func.func @transform_5(%arg0: i32) -> (i32, i32) {
    %c0_i32 = arith.constant 0 : i32
    %c0_i32_0 = arith.constant 0 : i32
    %c0_i32_1 = arith.constant 0 : i32
    return %c0_i32, %c0_i32_0 : i32, i32
  }
  func.func @transform_6(%arg0: i32) -> (i32, i32) {
    %c0_i32 = arith.constant 0 : i32
    %c0_i32_0 = arith.constant 0 : i32
    %c0_i32_1 = arith.constant 0 : i32
    return %c0_i32, %c0_i32_0 : i32, i32
  }
  func.func @transform_7(%arg0: i32) -> (i32, i32) {
    %c0_i32 = arith.constant 0 : i32
    %c0_i32_0 = arith.constant 0 : i32
    return %arg0, %c0_i32 : i32, i32
  }
}

</mosaic_0001>

<bundles_post_ra>
// kernel: tpu_custom_call.1
= control target key start
LH: loop header
LB: loop body
LE: loop exit
PB: predicated region body
PF: predicated region fallthrough
CT: control target
= control target key end

     0   :  { %12 = vsyncpa [#allocation3], 0  ;;  %s696_s0 = inlined_call_operand.hbm [shape: f32[8,16], index: 0, kind: input, shape index: {}]   ;;  %s697_s1 = inlined_call_operand.vmem [shape: f32[16,128], index: 1, kind: input, shape index: {}]   ;;  %s698_s2 = inlined_call_operand.vmem [shape: f32[1,128], index: 2, kind: input, shape index: {}]   ;;  %s699_s3 = inlined_call_operand.vmem [shape: f32[128,128], index: 3, kind: input, shape index: {}]   ;;  %s700_s4 = inlined_call_operand.vmem [shape: f32[1,128], index: 4, kind: input, shape index: {}]   ;;  %s701_s5 = inlined_call_operand.vmem [shape: f32[128,16], index: 5, kind: input, shape index: {}]   ;;  %s702_s6 = inlined_call_operand.vmem [shape: f32[1,16], index: 6, kind: input, shape index: {}]   ;;  %s703_s7 = inlined_call_operand.hbm [shape: f32[8,16], index: 7, kind: output, shape index: {}]  }
   0x1   :  { %13 = vsyncpa [#allocation4], 0  ;;  %s493_s24 = smov [#allocation2]  }
   0x2   :  { %s20_s25 = sshll.u32 %s493_s24, 4  ;;  %s21_s25 = int_to_ptr.vmem [resolvable:$true] %s20_s25 }
   0x3   :  { %s457_s26 = scalar_lea.vmem %s21_s25, 128  ;;  %p462_p1 = scmp.lt.s32.totalorder %s21_s25, %s21_s25 }
   0x4   :  { %p458_p0 = scmp.ne.s32.totalorder %s21_s25, %s457_s26  ;;  %p463_p2 = scmp.lt.s32.totalorder %s457_s26, %s457_s26 }
   0x6   :  { %p464_p3 = por %p463_p2, %p462_p1 }
   0x8   :  { %p465_p4 = pnand %p464_p3, %p458_p0 }
   0xa   :  { %468 = shalt.err (!%p465_p4)
}
   0xb   :  { %23 = dma.hbm_to_vmem [thread:$0]  %s696_s0, 128, %s21_s25, [#allocation3]  }
   0xc   :  { %489 = dma.done.wait [#allocation3], 128  }
   0xd   :  { %490 = vsyncadd [#allocation3], 4294967168  ;;  %v494_v0 = vmov 0.0   ;;  %vm495_vm0 = vmmov 0   ;;  %v41_v1 = vld [vmem:[%s697_s1 + $0x8] sm:$0xff]  ;;  %v40_v2 = vld [vmem:[%s697_s1] sm:$0xff] }
   0xe   :  { %368 = vmatprep.subr.mxu0 %v494_v0  ;;  %372 = vmatprep.mubr.msk.f32.mxu0 %vm495_vm0, %v494_v0  ;;  %v39_v3 = vld [vmem:[#allocation2] sm:$0xff]  ;;  %vm49_vm1 = vcmask 130048   ;;  %v139_v4 = vld [vmem:[%s699_s3 + $0x78] sm:$0xff]  ;;  %v138_v5 = vld [vmem:[%s699_s3 + $0x70] sm:$0xff]  ;;  %s496_s25 = smov [#allocation5]  }
   0xf   :  { %375 = vmatprep.subr.mxu1 %v494_v0  ;;  %407 = vmatprep.mubr.msk.f32.mxu1 %vm495_vm0, %v494_v0  ;;  %v137_v6 = vld [vmem:[%s699_s3 + $0x68] sm:$0xff]  ;;  %v136_v7 = vld [vmem:[%s699_s3 + $0x60] sm:$0xff]  ;;  %v135_v8 = vld [vmem:[%s699_s3 + $0x58] sm:$0xff]  ;;  %s318_s26 = sshll.u32 %s496_s25, 4  ;;  %s319_s26 = int_to_ptr.vmem [resolvable:$true] %s318_s26 }
  0x10   :  { %369 = vmatpush3.msra.mxu0 %v41_v1  ;;  %376 = vmatpush3.msra.mxu1 %v139_v4  ;;  %v134_v9 = vld [vmem:[%s699_s3 + $0x50] sm:$0xff]  ;;  %v133_v10 = vld [vmem:[%s699_s3 + $0x48] sm:$0xff]  ;;  %v132_v11 = vld [vmem:[%s699_s3 + $0x40] sm:$0xff]  ;;  %p474_p6 = scmp.lt.s32.totalorder %s319_s26, %s319_s26 }
  0x11   :  { %370 = vmatprep.subr.mxu0 %v494_v0  ;;  %377 = vmatprep.subr.mxu1 %v494_v0  ;;  %v131_v12 = vld [vmem:[%s699_s3 + $0x38] sm:$0xff]  ;;  %v130_v13 = vld [vmem:[%s699_s3 + $0x30] sm:$0xff]  ;;  %v129_v14 = vld [vmem:[%s699_s3 + $0x28] sm:$0xff] }
  0x12   :  { %371 = vmatpush3.msra.mxu0 %v40_v2  ;;  %378 = vmatpush3.msra.mxu1 %v138_v5  ;;  %v128_v15 = vld [vmem:[%s699_s3 + $0x20] sm:$0xff]  ;;  %v127_v16 = vld [vmem:[%s699_s3 + $0x18] sm:$0xff]  ;;  %v126_v17 = vld [vmem:[%s699_s3 + $0x10] sm:$0xff] }
  0x13   :  { %373 = vmatmul.mubr.msk.f32.vlgmr.msra.gmra.mxu0 %vm49_vm1, %v39_v3  ;;  %379 = vmatprep.subr.mxu1 %v494_v0  ;;  %v125_v18 = vld [vmem:[%s699_s3 + $0x8] sm:$0xff]  ;;  %v124_v19 = vld [vmem:[%s699_s3] sm:$0xff]  ;;  %v233_v20 = vld [vmem:[%s701_s5 + $0x78] sm:$0xff] }
  0x14   :  { %410 = vmatprep.subr.mxu0 %v494_v0  ;;  %380 = vmatpush3.msra.mxu1 %v137_v6  ;;  %v232_v21 = vld [vmem:[%s701_s5 + $0x70] sm:$0xff]  ;;  %v231_v22 = vld [vmem:[%s701_s5 + $0x68] sm:$0xff]  ;;  %v230_v23 = vld [vmem:[%s701_s5 + $0x60] sm:$0xff] }
  0x15   :  { %442 = vmatprep.mubr.msk.f32.mxu0 %vm495_vm0, %v494_v0  ;;  %381 = vmatprep.subr.mxu1 %v494_v0  ;;  %v229_v24 = vld [vmem:[%s701_s5 + $0x58] sm:$0xff]  ;;  %v228_v25 = vld [vmem:[%s701_s5 + $0x50] sm:$0xff]  ;;  %v227_v26 = vld [vmem:[%s701_s5 + $0x48] sm:$0xff] }
  0x16   :  { %382 = vmatpush3.msra.mxu1 %v136_v7  ;;  %411 = vmatpush3.msra.mxu0 %v233_v20  ;;  %v226_v27 = vld [vmem:[%s701_s5 + $0x40] sm:$0xff]  ;;  %v225_v28 = vld [vmem:[%s701_s5 + $0x38] sm:$0xff]  ;;  %v224_v29 = vld [vmem:[%s701_s5 + $0x30] sm:$0xff] }
  0x17   :  { %383 = vmatprep.subr.mxu1 %v494_v0  ;;  %412 = vmatprep.subr.mxu0 %v494_v0  ;;  %v223_v30 = vld [vmem:[%s701_s5 + $0x28] sm:$0xff]  ;;  %v222_v31 = vld [vmem:[%s701_s5 + $0x20] sm:$0xff]  ;;  %v221_v32 = vld [vmem:[%s701_s5 + $0x18] sm:$0xff] }
  0x18   :  { %384 = vmatpush3.msra.mxu1 %v135_v8  ;;  %413 = vmatpush3.msra.mxu0 %v232_v21  ;;  %v327_v33 = vld [vmem:[%s698_s2] ss:$0 sm:$0xff]  ;;  %v220_v38 = vld [vmem:[%s701_s5 + $0x10] sm:$0xff]  ;;  %v219_v39 = vld [vmem:[%s701_s5 + $0x8] sm:$0xff] }
  0x19   :  { %385 = vmatprep.subr.mxu1 %v494_v0  ;;  %414 = vmatprep.subr.mxu0 %v494_v0  ;;  %v218_v40 = vld [vmem:[%s701_s5] sm:$0xff]  ;;  %s469_s5 = scalar_lea.vmem %s319_s26, 128 }
  0x1a   :  { %386 = vmatpush3.msra.mxu1 %v134_v9  ;;  %415 = vmatpush3.msra.mxu0 %v231_v22  ;;  %v329_v41 = vld [vmem:[%s700_s4] ss:$0 sm:$0xff]  ;;  %p470_p5 = scmp.ne.s32.totalorder %s319_s26, %s469_s5  ;;  %p475_p7 = scmp.lt.s32.totalorder %s469_s5, %s469_s5 }
  0x1b   :  { %387 = vmatprep.subr.mxu1 %v494_v0  ;;  %416 = vmatprep.subr.mxu0 %v494_v0  ;;  %v330_v46 = vld [vmem:[%s702_s6] ss:$0 sm:$0xff] }
  0x1c   :  { %388 = vmatpush3.msra.mxu1 %v133_v10  ;;  %417 = vmatpush3.msra.mxu0 %v230_v23  ;;  %p476_p8 = por %p475_p7, %p474_p6 }
  0x1d   :  { %389 = vmatprep.subr.mxu1 %v494_v0  ;;  %418 = vmatprep.subr.mxu0 %v494_v0 }
  0x1e   :  { %390 = vmatpush3.msra.mxu1 %v132_v11  ;;  %419 = vmatpush3.msra.mxu0 %v229_v24  ;;  %p477_p9 = pnand %p476_p8, %p470_p5 }
  0x1f   :  { %391 = vmatprep.subr.mxu1 %v494_v0  ;;  %420 = vmatprep.subr.mxu0 %v494_v0 }
  0x20   :  { %392 = vmatpush3.msra.mxu1 %v131_v12  ;;  %421 = vmatpush3.msra.mxu0 %v228_v25 }
  0x21   :  { %393 = vmatprep.subr.mxu1 %v494_v0  ;;  %422 = vmatprep.subr.mxu0 %v494_v0 }
  0x22   :  { %394 = vmatpush3.msra.mxu1 %v130_v13  ;;  %423 = vmatpush3.msra.mxu0 %v227_v26 }
  0x23   :  { %395 = vmatprep.subr.mxu1 %v494_v0  ;;  %424 = vmatprep.subr.mxu0 %v494_v0 }
  0x24   :  { %396 = vmatpush3.msra.mxu1 %v129_v14  ;;  %425 = vmatpush3.msra.mxu0 %v226_v27 }
  0x25   :  { %397 = vmatprep.subr.mxu1 %v494_v0  ;;  %426 = vmatprep.subr.mxu0 %v494_v0 }
  0x26   :  { %398 = vmatpush3.msra.mxu1 %v128_v15  ;;  %427 = vmatpush3.msra.mxu0 %v225_v28 }
  0x27   :  { %399 = vmatprep.subr.mxu1 %v494_v0  ;;  %428 = vmatprep.subr.mxu0 %v494_v0 }
  0x28   :  { %400 = vmatpush3.msra.mxu1 %v127_v16  ;;  %429 = vmatpush3.msra.mxu0 %v224_v29 }
  0x29   :  { %401 = vmatprep.subr.mxu1 %v494_v0  ;;  %430 = vmatprep.subr.mxu0 %v494_v0 }
  0x2a   :  { %402 = vmatpush3.msra.mxu1 %v126_v17  ;;  %431 = vmatpush3.msra.mxu0 %v223_v30 }
  0x2b   :  { %403 = vmatprep.subr.mxu1 %v494_v0  ;;  %432 = vmatprep.subr.mxu0 %v494_v0 }
  0x2c   :  { %404 = vmatpush3.msra.mxu1 %v125_v18  ;;  %433 = vmatpush3.msra.mxu0 %v222_v31 }
  0x2d   :  { %405 = vmatprep.subr.mxu1 %v494_v0  ;;  %434 = vmatprep.subr.mxu0 %v494_v0 }
  0x2e   :  { %406 = vmatpush3.msra.mxu1 %v124_v19  ;;  %435 = vmatpush3.msra.mxu0 %v221_v32 }
  0x2f   :  { %436 = vmatprep.subr.mxu0 %v494_v0 }
  0x30   :  { %437 = vmatpush3.msra.mxu0 %v220_v38 }
  0x31   :  { %438 = vmatprep.subr.mxu0 %v494_v0 }
  0x32   :  { %439 = vmatpush3.msra.mxu0 %v219_v39 }
  0x33   :  { %440 = vmatprep.subr.mxu0 %v494_v0 }
  0x34   :  { %441 = vmatpush3.msra.mxu0 %v218_v40 }
  0xd3   :  { %v119_v34 = vpop.f32.mrf.mxu0 }
  0xd4   :  { %v120_v35 = vadd.f32 %v327_v33, %v119_v34 }
  0xd5   :  { %v374_v36 = vpop.f32.mrf.mxu0 }
  0xd6   :  { %v123_v37 = vmax.f32 %v120_v35, 0.0 }
  0xd8   :  { %408 = vmatmul.mubr.f32.vlgmr.msra.gmra.mxu1 %v123_v37 }
 0x198   :  { %v213_v42 = vpop.f32.mrf.mxu1 }
 0x199   :  { %v214_v43 = vadd.f32 %v329_v41, %v213_v42 }
 0x19a   :  { %v409_v44 = vpop.f32.mrf.mxu1 }
 0x19b   :  { %v217_v45 = vmax.f32 %v214_v43, 0.0 }
 0x19d   :  { %443 = vmatmul.mubr.f32.vlgmr.msra.gmra.mxu0 %v217_v45 }
 0x25d   :  { %v307_v47 = vpop.f32.mrf.mxu0 }
 0x25e   :  { %v308_v48 = vadd.f32 %v330_v46, %v307_v47 }
 0x25f   :  { %v444_v49 = vpop.f32.mrf.mxu0 }
 0x260   :  { %311 = vst.msk [vmem:[#allocation5] sm:$0xff] %vm49_vm1, %v308_v48 }
 0x261   :  { %480 = shalt.err (!%p477_p9)
}
 0x262   :  { %321 = dma.vmem_to_hbm [thread:$0]  %s319_s26, 128, %s703_s7, [#allocation4]  }
 0x263   :  { %491 = dma.done.wait [#allocation4], 128  }
 0x264   :  { %492 = vsyncadd [#allocation4], 4294967168 }
 0x265   :  { %325 = vsyncpa [#allocation3], 1 }
 0x266   :  { %326 = vsyncpa [#allocation4], 1 }

</bundles_post_ra>
